<compile_context>
chip_gen: v7x
topology: tpu7x:2x2x1
jax: 0.10.0
libtpu: 0.0.40
codegen_flags: <defaults>
</compile_context>

<pallas_src>
import functools

import jax
import jax.numpy as jnp
from jax.experimental import pallas as pl
from jax.experimental.pallas import tpu as pltpu

LANE = 128     # lane width (last dim)
SUBLANE = 8    # sublane width (second-to-last dim)


def _round_up(x, m):
    return (x + m - 1) // m * m


def _highway_epilogue(h):
    """Highway combine from a single transcendental.

    With tau = tanh(h/2):  sigmoid(h) = 0.5*(1+tau),  tanh(h) = 2*tau/(1+tau^2),
    so one tanh chain through the EUP replaces sigmoid(h) + tanh(h).
    (The divide could become pl.reciprocal(..., approx=True) if profiling shows
    the EUP slot binding and the accuracy budget allows it.)
    """
    tau = jnp.tanh(0.5 * h)
    gate = 0.5 * (1.0 + tau)
    tanh_h = (tau + tau) / (1.0 + tau * tau)
    return h + gate * (tanh_h - h)          # == gate*tanh(h) + (1-gate)*h


def fused_highway_kernel(x_ref, w1_ref, b1_ref, w2_ref, b2_ref, o_ref):
    """One batch tile through both highway layers; intermediate stays on-chip."""
    x = x_ref[...]

    # ---- layer 1: shared pre-activation for gate / nonlinear / linear ----
    h1 = jnp.dot(x, w1_ref[...], preferred_element_type=jnp.float32) + b1_ref[...]
    y1 = _highway_epilogue(h1)              # kept in f32 (MXU accepts f32 LHS)

    # ---- layer 2 ----
    h2 = jnp.dot(y1, w2_ref[...], preferred_element_type=jnp.float32) + b2_ref[...]
    o_ref[...] = _highway_epilogue(h2).astype(o_ref.dtype)


def init_linear_params(key, fan_in, fan_out, dtype=jnp.float32):
    """Deterministic init mimicking nn.Linear default: U(-1/sqrt(fan_in), +)."""
    kw, kb = jax.random.split(key)
    bound = 1.0 / (fan_in ** 0.5)
    # Stored as (in, out) so the kernel computes x @ W directly.
    w = jax.random.uniform(kw, (fan_in, fan_out), dtype, minval=-bound, maxval=bound)
    b = jax.random.uniform(kb, (fan_out,), dtype, minval=-bound, maxval=bound)
    return w, b


def prepare_params(params, dtype=jnp.float32):
    """Zero-pad linear params for the kernel.

    Layer 0's input dim is left UNPADDED (it matches x's true feature width, so
    the dominant HBM read of x is not inflated 4x).  Every output dim — and
    therefore every later layer's input dim — is padded to a multiple of 128
    lanes so all MXU feeds and the final store are lane-dense.  Zero padding is
    numerically inert: padded h columns are exactly 0 and the highway epilogue
    maps 0 -> 0, so padded activation columns stay 0 through every layer.
    """
    padded = []
    prev_out_padded = None
    for idx, (w, b) in enumerate(params):
        din, dout = w.shape
        dinp = din if idx == 0 else prev_out_padded
        doutp = _round_up(dout, LANE)
        wp = jnp.zeros((dinp, doutp), dtype).at[:din, :dout].set(w.astype(dtype))
        bp = jnp.zeros((1, doutp), jnp.float32).at[0, :dout].set(b.astype(jnp.float32))
        padded.append((wp, bp))
        prev_out_padded = doutp
    return padded


def _choose_batch_tile(B):
    """Batch tile: multiple of 8, >=2 (ideally >=4) grid steps for v7x's two
    TensorCores, large enough to amortize the ~0.35us/step overhead, and sized
    to keep batch padding small (no more 513 -> 1024 blowups)."""
    b8 = _round_up(B, SUBLANE)
    if b8 <= 2 * SUBLANE:                  # tiny batch: a single tile
        return b8
    tiles = 4 if b8 >= 4 * SUBLANE else 2
    tb = _round_up(-(-b8 // tiles), SUBLANE)
    # Cap keeps the double-buffered tiles + f32 intermediates comfortably under
    # every generation's DEFAULT scoped-VMEM limit (could go 2048-4096 with a
    # matching vmem_limit_bytes bump if per-step overhead ever binds).
    return min(1024, tb)


@jax.jit
def simple_highway_network(x, w1, b1, w2, b2):
    """x: (B, Din) unpadded; params already prepared via prepare_params.

    Returns the lane-padded (Bp, 128) output; callers slice [:B, :10] (or hand
    the padded buffer straight to the next consumer).
    """
    B, Din = x.shape
    HP = w1.shape[1]
    OP = w2.shape[1]

    TB = _choose_batch_tile(B)
    Bp = _round_up(B, TB)
    if Bp != B:
        # Batch-only pad: (Bp - B) * Din elements — cheap, keeps blocks aligned.
        x = jnp.pad(x, ((0, Bp - B), (0, 0)))

    return pl.pallas_call(
        fused_highway_kernel,
        out_shape=jax.ShapeDtypeStruct((Bp, OP), x.dtype),
        grid_spec=pltpu.PrefetchScalarGridSpec(
            num_scalar_prefetch=0,
            grid=(Bp // TB,),
            in_specs=[
                # Activations stream per batch tile at their NATIVE lane width
                # (last block dim == full array dim -> legal; no 128-padding).
                pl.BlockSpec((TB, Din), lambda i: (i, 0)),
                # Weights / biases: constant block index -> fetched once and
                # kept VMEM-resident across all batch tiles.
                pl.BlockSpec((Din, HP), lambda i: (0, 0)),
                pl.BlockSpec((1, HP), lambda i: (0, 0)),
                pl.BlockSpec((HP, OP), lambda i: (0, 0)),
                pl.BlockSpec((1, OP), lambda i: (0, 0)),
            ],
            # 128-lane-wide output -> unmasked vst stores.
            out_specs=pl.BlockSpec((TB, OP), lambda i: (i, 0)),
        ),
        compiler_params=pltpu.CompilerParams(
            # Independent batch tiles: shard across v7x's two TensorCores.
            dimension_semantics=("parallel",),
            # No vmem_limit override: footprint is a few MiB; the default scoped
            # limit leaves compiler headroom (don't claim all of v7x's 64 MiB).
        ),
    )(x, w1, b1, w2, b2)


if __name__ == "__main__":
    nin = 32          # input feature size
    batch = 8

    key = jax.random.PRNGKey(0)
    kx, k1, k2 = jax.random.split(key, 3)

    # Layer shapes from __init__: Linear(nin, 50), Linear(50, 10)
    w1, b1 = init_linear_params(k1, nin, 50)
    w2, b2 = init_linear_params(k2, 50, 10)
    (w1p, b1p), (w2p, b2p) = prepare_params([(w1, b1), (w2, b2)])

    x = jax.random.normal(kx, (batch, nin), dtype=jnp.float32)

    out_padded = simple_highway_network(x, w1p, b1p, w2p, b2p)
    out_padded = jax.block_until_ready(out_padded)

    out = out_padded[:batch, :10]          # consumer-side slice of padded buffer
    assert out.shape == (batch, 10), out.shape

    # Cross-check against a pure-JAX reference of the same (unpadded) math.
    ref = x
    for (w, b) in [(w1, b1), (w2, b2)]:
        h = ref @ w + b
        g = jax.nn.sigmoid(h)
        ref = g * jnp.tanh(h) + (1.0 - g) * h
    assert jnp.allclose(out, ref, atol=1e-5, rtol=1e-5), \
        float(jnp.abs(out - ref).max())

    print("KERNEL_OK")
</pallas_src>

<mosaic_0001>
module attributes {stable_mosaic.version = 11 : i64} {
  func.func @fused_highway_kernel(%arg0: i32, %arg1: memref<8x32xf32, #tpu.memory_space<vmem>>, %arg2: memref<32x128xf32, #tpu.memory_space<vmem>>, %arg3: memref<1x128xf32, #tpu.memory_space<vmem>>, %arg4: memref<128x128xf32, #tpu.memory_space<vmem>>, %arg5: memref<1x128xf32, #tpu.memory_space<vmem>>, %arg6: memref<8x128xf32, #tpu.memory_space<vmem>>) attributes {dimension_semantics = [#tpu.dimension_semantics<parallel>], iteration_bounds = array<i64: 1>, scalar_prefetch = 0 : i64, scratch_operands = 0 : i64, tpu.core_type = #tpu.core_type<tc>, window_params = [{transform_indices = @transform_0, window_bounds = array<i64: 8, 32>}, {pipeline_mode = #tpu.pipeline_mode<synchronous>, transform_indices = @transform_1, window_bounds = array<i64: 32, 128>}, {pipeline_mode = #tpu.pipeline_mode<synchronous>, transform_indices = @transform_2, window_bounds = array<i64: 1, 128>}, {pipeline_mode = #tpu.pipeline_mode<synchronous>, transform_indices = @transform_3, window_bounds = array<i64: 128, 128>}, {pipeline_mode = #tpu.pipeline_mode<synchronous>, transform_indices = @transform_4, window_bounds = array<i64: 1, 128>}, {transform_indices = @transform_5, window_bounds = array<i64: 8, 128>}]} {
    %c0 = arith.constant 0 : index
    %c0_0 = arith.constant 0 : index
    %0 = vector.load %arg1[%c0, %c0_0] : memref<8x32xf32, #tpu.memory_space<vmem>>, vector<8x32xf32>
    %c0_1 = arith.constant 0 : index
    %c0_2 = arith.constant 0 : index
    %1 = vector.load %arg2[%c0_1, %c0_2] : memref<32x128xf32, #tpu.memory_space<vmem>>, vector<32x128xf32>
    %cst = arith.constant dense<0.000000e+00> : vector<8x128xf32>
    %2 = tpu.matmul %0, %1, %cst {dimension_numbers = #tpu.dot_dimension_numbers<[1], [0], [0], [1], [0, 0, 1, 1], [], []>} : vector<8x32xf32>, vector<32x128xf32>, vector<8x128xf32> -> vector<8x128xf32>
    %c0_3 = arith.constant 0 : index
    %c0_4 = arith.constant 0 : index
    %3 = vector.load %arg3[%c0_3, %c0_4] : memref<1x128xf32, #tpu.memory_space<vmem>>, vector<1x128xf32>
    %4 = vector.broadcast %3 : vector<1x128xf32> to vector<8x128xf32>
    %5 = arith.addf %2, %4 : vector<8x128xf32>
    %cst_5 = arith.constant 5.000000e-01 : f32
    %6 = vector.broadcast %cst_5 : f32 to vector<8x128xf32>
    %7 = arith.mulf %6, %5 : vector<8x128xf32>
    %8 = math.tanh %7 : vector<8x128xf32>
    %cst_6 = arith.constant 1.000000e+00 : f32
    %9 = vector.broadcast %cst_6 : f32 to vector<8x128xf32>
    %10 = arith.addf %9, %8 : vector<8x128xf32>
    %cst_7 = arith.constant 5.000000e-01 : f32
    %11 = vector.broadcast %cst_7 : f32 to vector<8x128xf32>
    %12 = arith.mulf %11, %10 : vector<8x128xf32>
    %13 = arith.addf %8, %8 : vector<8x128xf32>
    %14 = arith.mulf %8, %8 : vector<8x128xf32>
    %cst_8 = arith.constant 1.000000e+00 : f32
    %15 = vector.broadcast %cst_8 : f32 to vector<8x128xf32>
    %16 = arith.addf %15, %14 : vector<8x128xf32>
    %17 = arith.divf %13, %16 : vector<8x128xf32>
    %18 = arith.subf %17, %5 : vector<8x128xf32>
    %19 = arith.mulf %12, %18 : vector<8x128xf32>
    %20 = arith.addf %5, %19 : vector<8x128xf32>
    %c0_9 = arith.constant 0 : index
    %c0_10 = arith.constant 0 : index
    %21 = vector.load %arg4[%c0_9, %c0_10] : memref<128x128xf32, #tpu.memory_space<vmem>>, vector<128x128xf32>
    %cst_11 = arith.constant dense<0.000000e+00> : vector<8x128xf32>
    %22 = tpu.matmul %20, %21, %cst_11 {dimension_numbers = #tpu.dot_dimension_numbers<[1], [0], [0], [1], [0, 0, 1, 1], [], []>} : vector<8x128xf32>, vector<128x128xf32>, vector<8x128xf32> -> vector<8x128xf32>
    %c0_12 = arith.constant 0 : index
    %c0_13 = arith.constant 0 : index
    %23 = vector.load %arg5[%c0_12, %c0_13] : memref<1x128xf32, #tpu.memory_space<vmem>>, vector<1x128xf32>
    %24 = vector.broadcast %23 : vector<1x128xf32> to vector<8x128xf32>
    %25 = arith.addf %22, %24 : vector<8x128xf32>
    %cst_14 = arith.constant 5.000000e-01 : f32
    %26 = vector.broadcast %cst_14 : f32 to vector<8x128xf32>
    %27 = arith.mulf %26, %25 : vector<8x128xf32>
    %28 = math.tanh %27 : vector<8x128xf32>
    %cst_15 = arith.constant 1.000000e+00 : f32
    %29 = vector.broadcast %cst_15 : f32 to vector<8x128xf32>
    %30 = arith.addf %29, %28 : vector<8x128xf32>
    %cst_16 = arith.constant 5.000000e-01 : f32
    %31 = vector.broadcast %cst_16 : f32 to vector<8x128xf32>
    %32 = arith.mulf %31, %30 : vector<8x128xf32>
    %33 = arith.addf %28, %28 : vector<8x128xf32>
    %34 = arith.mulf %28, %28 : vector<8x128xf32>
    %cst_17 = arith.constant 1.000000e+00 : f32
    %35 = vector.broadcast %cst_17 : f32 to vector<8x128xf32>
    %36 = arith.addf %35, %34 : vector<8x128xf32>
    %37 = arith.divf %33, %36 : vector<8x128xf32>
    %38 = arith.subf %37, %25 : vector<8x128xf32>
    %39 = arith.mulf %32, %38 : vector<8x128xf32>
    %40 = arith.addf %25, %39 : vector<8x128xf32>
    %c0_18 = arith.constant 0 : index
    %c0_19 = arith.constant 0 : index
    %41 = vector.load %arg6[%c0_18, %c0_19] : memref<8x128xf32, #tpu.memory_space<vmem>>, vector<8x128xf32>
    tpu.vector_store %arg6[%c0_18, %c0_19], %40 {strides = array<i32>} : memref<8x128xf32, #tpu.memory_space<vmem>>, vector<8x128xf32>,
    return
  }
  func.func @transform_0(%arg0: i32) -> (i32, i32) {
    %c0_i32 = arith.constant 0 : i32
    %c0_i32_0 = arith.constant 0 : i32
    return %arg0, %c0_i32 : i32, i32
  }
  func.func @transform_1(%arg0: i32) -> (i32, i32) {
    %c0_i32 = arith.constant 0 : i32
    %c0_i32_0 = arith.constant 0 : i32
    %c0_i32_1 = arith.constant 0 : i32
    return %c0_i32, %c0_i32_0 : i32, i32
  }
  func.func @transform_2(%arg0: i32) -> (i32, i32) {
    %c0_i32 = arith.constant 0 : i32
    %c0_i32_0 = arith.constant 0 : i32
    %c0_i32_1 = arith.constant 0 : i32
    return %c0_i32, %c0_i32_0 : i32, i32
  }
  func.func @transform_3(%arg0: i32) -> (i32, i32) {
    %c0_i32 = arith.constant 0 : i32
    %c0_i32_0 = arith.constant 0 : i32
    %c0_i32_1 = arith.constant 0 : i32
    return %c0_i32, %c0_i32_0 : i32, i32
  }
  func.func @transform_4(%arg0: i32) -> (i32, i32) {
    %c0_i32 = arith.constant 0 : i32
    %c0_i32_0 = arith.constant 0 : i32
    %c0_i32_1 = arith.constant 0 : i32
    return %c0_i32, %c0_i32_0 : i32, i32
  }
  func.func @transform_5(%arg0: i32) -> (i32, i32) {
    %c0_i32 = arith.constant 0 : i32
    %c0_i32_0 = arith.constant 0 : i32
    return %arg0, %c0_i32 : i32, i32
  }
}

</mosaic_0001>

<bundles_post_ra>
// kernel: simple_highway_network.1
= control target key start
LH: loop header
LB: loop body
LE: loop exit
PB: predicated region body
PF: predicated region fallthrough
CT: control target
= control target key end

     0   :  { %10 = vsyncpa [#allocation3], 0  ;;  %s591_s0 = inlined_call_operand.hbm [shape: f32[8,32], index: 0, kind: input, shape index: {}]   ;;  %s592_s1 = inlined_call_operand.hbm [shape: f32[32,128], index: 1, kind: input, shape index: {}]   ;;  %s593_s2 = inlined_call_operand.vmem [shape: f32[1,128], index: 2, kind: input, shape index: {}]   ;;  %s594_s3 = inlined_call_operand.hbm [shape: f32[128,128], index: 3, kind: input, shape index: {}]   ;;  %s595_s4 = inlined_call_operand.vmem [shape: f32[1,128], index: 4, kind: input, shape index: {}]   ;;  %s596_s5 = inlined_call_operand.hbm [shape: f32[8,128], index: 5, kind: output, shape index: {}]  }
   0x1   :  { %11 = vsyncpa [#allocation6], 0 }
   0x2   :  { %12 = vsyncpa [#allocation4], 0  ;;  %s492_s18 = smov [#allocation5]   ;;  %s398_s22 = scalar_lea.hbm %s592_s1, 512 }
   0x3   :  { %s28_s19 = sshll.u32 %s492_s18, 4  ;;  %p399_p0 = scmp.ne.s32.totalorder %s592_s1, %s398_s22  ;;  %s29_s19 = int_to_ptr.vmem [resolvable:$true] %s28_s19 }
   0x4   :  { %p402_p1 = scmp.lt.u32.totalorder %s398_s22, %s592_s1 }
   0x6   :  { %p404_p2 = pnand %p402_p1, %p399_p0 }
   0x8   :  { %407 = shalt.err (!%p404_p2)
}
   0x9   :  { %s408_s27 = scalar_lea.vmem %s29_s19, 512  ;;  %p413_p4 = scmp.lt.s32.totalorder %s29_s19, %s29_s19 }
   0xa   :  { %p409_p3 = scmp.ne.s32.totalorder %s29_s19, %s408_s27  ;;  %p414_p5 = scmp.lt.s32.totalorder %s408_s27, %s408_s27 }
   0xc   :  { %p415_p6 = por %p414_p5, %p413_p4 }
   0xe   :  { %p416_p7 = pnand %p415_p6, %p409_p3 }
  0x10   :  { %419 = shalt.err (!%p416_p7)
}
  0x11   :  { %s493_s28 = smov 128   ;;  %s494_s29 = smov 8  }
  0x12   :  { %34 = dma.hbm_to_vmem [thread:$0]  %s592_s1, 512, %s29_s19, [#allocation6], %s493_s28, %s493_s28, %s494_s29  }
  0x13   :  { %s495_s7 = smov [#allocation2]   ;;  %s496_s9 = smov [#allocation7]  }
  0x14   :  { %s19_s8 = sshll.u32 %s495_s7, 4  ;;  %s42_s10 = sshll.u32 %s496_s9, 4  ;;  %s20_s8 = int_to_ptr.vmem [resolvable:$true] %s19_s8  ;;  %s43_s10 = int_to_ptr.vmem [resolvable:$true] %s42_s10 }
  0x15   :  { %s420_s13 = scalar_lea.hbm %s591_s0, 128 }
  0x16   :  { %p421_p8 = scmp.ne.s32.totalorder %s591_s0, %s420_s13  ;;  %p424_p9 = scmp.lt.u32.totalorder %s420_s13, %s591_s0 }
  0x18   :  { %p426_p10 = pnand %p424_p9, %p421_p8 }
  0x1a   :  { %429 = shalt.err (!%p426_p10)
}
  0x1b   :  { %s430_s1 = scalar_lea.vmem %s20_s8, 128  ;;  %p435_p12 = scmp.lt.s32.totalorder %s20_s8, %s20_s8 }
  0x1c   :  { %p431_p11 = scmp.ne.s32.totalorder %s20_s8, %s430_s1  ;;  %p436_p13 = scmp.lt.s32.totalorder %s430_s1, %s430_s1 }
  0x1e   :  { %p437_p0 = por %p436_p13, %p435_p12 }
  0x20   :  { %p438_p1 = pnand %p437_p0, %p431_p11 }
  0x22   :  { %441 = shalt.err (!%p438_p1)
}
  0x23   :  { %22 = dma.hbm_to_vmem [thread:$0]  %s591_s0, 128, %s20_s8, [#allocation3]  }
  0x24   :  { %s442_s22 = scalar_lea.hbm %s594_s3, 2048 }
  0x25   :  { %p443_p2 = scmp.ne.s32.totalorder %s594_s3, %s442_s22  ;;  %p446_p3 = scmp.lt.u32.totalorder %s442_s22, %s594_s3 }
  0x27   :  { %p448_p4 = pnand %p446_p3, %p443_p2 }
  0x29   :  { %451 = shalt.err (!%p448_p4)
}
  0x2a   :  { %s452_s27 = scalar_lea.vmem %s43_s10, 2048  ;;  %p457_p6 = scmp.lt.s32.totalorder %s43_s10, %s43_s10 }
  0x2b   :  { %p453_p5 = scmp.ne.s32.totalorder %s43_s10, %s452_s27  ;;  %p458_p7 = scmp.lt.s32.totalorder %s452_s27, %s452_s27 }
  0x2d   :  { %p459_p8 = por %p458_p7, %p457_p6 }
  0x2f   :  { %p460_p9 = pnand %p459_p8, %p453_p5 }
  0x31   :  { %463 = shalt.err (!%p460_p9)
}
  0x32   :  { %48 = dma.hbm_to_vmem [thread:$0]  %s594_s3, 2048, %s43_s10, [#allocation6], %s493_s28, %s493_s28, %s494_s29  }
  0x33   :  { %486 = dma.done.wait [#allocation3], 128  }
  0x34   :  { %487 = vsyncadd [#allocation3], 4294967168 }
  0x35   :  { %488 = dma.done.wait [#allocation6], 2560  }
  0x36   :  { %489 = vsyncadd [#allocation6], 4294964736  ;;  %v497_v0 = vmov 0.0|0.0   ;;  %vm498_vm0 = vmmov 0   ;;  %v499_v1 = vmov 0.0   ;;  %v61_v2 = vld [vmem:[#allocation5] sm:$0xff] }
  0x37   :  { %351 = vmatprep.subr.bf16.mxu0 %v497_v0  ;;  %313 = vmatprep.mubr.msk.f32.mxu0 %vm498_vm0, %v499_v1  ;;  %v62_v3 = vld [vmem:[#allocation5 + $0x8] sm:$0xff]  ;;  %v63_v4 = vld [vmem:[#allocation5 + $0x10] sm:$0xff]  ;;  %v64_v6 = vld [vmem:[#allocation5 + $0x18] sm:$0xff]  ;;  %vm72_vm1 = vcmask 261120   ;;  %s500_s6 = smov [#allocation8]  }
  0x38   :  { %357 = vmatprep.subr.bf16.mxu1 %v497_v0  ;;  %348 = vmatprep.mubr.msk.f32.mxu1 %vm498_vm0, %v499_v1  ;;  %v352_v5 = vpack.c.bf16 %v62_v3, %v61_v2  ;;  %v355_v7 = vpack.c.bf16 %v64_v6, %v63_v4  ;;  %v60_v8 = vld [vmem:[#allocation2] sm:$0xff]  ;;  %v158_v9 = vld [vmem:[#allocation7] sm:$0xff]  ;;  %v159_v10 = vld [vmem:[#allocation7 + $0x8] sm:$0xff]  ;;  %s270_s7 = sshll.u32 %s500_s6, 4  ;;  %s271_s7 = int_to_ptr.vmem [resolvable:$true] %s270_s7 }
  0x39   :  { %v358_v11 = vpack.c.bf16 %v159_v10, %v158_v9  ;;  %v160_v12 = vld [vmem:[#allocation7 + $0x10] sm:$0xff]  ;;  %v161_v13 = vld [vmem:[#allocation7 + $0x18] sm:$0xff]  ;;  %v162_v15 = vld [vmem:[#allocation7 + $0x20] sm:$0xff]  ;;  %p469_p11 = scmp.lt.s32.totalorder %s271_s7, %s271_s7 }
  0x3a   :  { %353 = vmatpush3.bf16.msra.mxu0 %v352_v5  ;;  %v361_v14 = vpack.c.bf16 %v161_v13, %v160_v12  ;;  %v163_v16 = vld [vmem:[#allocation7 + $0x28] sm:$0xff]  ;;  %v164_v18 = vld [vmem:[#allocation7 + $0x30] sm:$0xff]  ;;  %v165_v19 = vld [vmem:[#allocation7 + $0x38] sm:$0xff] }
  0x3b   :  { %354 = vmatprep.subr.bf16.mxu0 %v497_v0  ;;  %359 = vmatpush3.bf16.msra.mxu1 %v358_v11  ;;  %v364_v17 = vpack.c.bf16 %v163_v16, %v162_v15  ;;  %v367_v20 = vpack.c.bf16 %v165_v19, %v164_v18  ;;  %v166_v21 = vld [vmem:[#allocation7 + $0x40] sm:$0xff]  ;;  %v167_v22 = vld [vmem:[#allocation7 + $0x48] sm:$0xff]  ;;  %v168_v24 = vld [vmem:[#allocation7 + $0x50] sm:$0xff] }
  0x3c   :  { %360 = vmatprep.subr.bf16.mxu1 %v497_v0  ;;  %v370_v23 = vpack.c.bf16 %v167_v22, %v166_v21  ;;  %v169_v25 = vld [vmem:[#allocation7 + $0x58] sm:$0xff]  ;;  %v170_v27 = vld [vmem:[#allocation7 + $0x60] sm:$0xff]  ;;  %v171_v28 = vld [vmem:[#allocation7 + $0x68] sm:$0xff] }
  0x3d   :  { %v373_v26 = vpack.c.bf16 %v169_v25, %v168_v24  ;;  %v376_v29 = vpack.c.bf16 %v171_v28, %v170_v27  ;;  %v172_v30 = vld [vmem:[#allocation7 + $0x70] sm:$0xff]  ;;  %v173_v31 = vld [vmem:[#allocation7 + $0x78] sm:$0xff] }
  0x3e   :  { %356 = vmatpush3.bf16.msra.mxu0 %v355_v7  ;;  %v379_v32 = vpack.c.bf16 %v173_v31, %v172_v30  ;;  %v280_v33 = vld [vmem:[%s593_s2] ss:$0 sm:$0xff] }
  0x3f   :  { %362 = vmatpush3.bf16.msra.mxu1 %v361_v14  ;;  %v282_v49 = vld [vmem:[%s595_s4] ss:$0 sm:$0xff]  ;;  %s464_s4 = scalar_lea.vmem %s271_s7, 128 }
  0x40   :  { %363 = vmatprep.subr.bf16.mxu1 %v497_v0  ;;  %p465_p10 = scmp.ne.s32.totalorder %s271_s7, %s464_s4  ;;  %p470_p12 = scmp.lt.s32.totalorder %s464_s4, %s464_s4 }
  0x41   :  { %314 = vmatmul.mubr.msk.f32.vlgmr.msra.gmra.mrb[0].mxu0 %vm72_vm1, %v60_v8 }
  0x42   :  { %p471_p13 = por %p470_p12, %p469_p11 }
  0x43   :  { %365 = vmatpush3.bf16.msra.mxu1 %v364_v17 }
  0x44   :  { %366 = vmatprep.subr.bf16.mxu1 %v497_v0  ;;  %p472_p0 = pnand %p471_p13, %p465_p10 }
  0x47   :  { %368 = vmatpush3.bf16.msra.mxu1 %v367_v20 }
  0x48   :  { %369 = vmatprep.subr.bf16.mxu1 %v497_v0 }
  0x4b   :  { %371 = vmatpush3.bf16.msra.mxu1 %v370_v23 }
  0x4c   :  { %372 = vmatprep.subr.bf16.mxu1 %v497_v0 }
  0x4f   :  { %374 = vmatpush3.bf16.msra.mxu1 %v373_v26 }
  0x50   :  { %375 = vmatprep.subr.bf16.mxu1 %v497_v0 }
  0x53   :  { %377 = vmatpush3.bf16.msra.mxu1 %v376_v29 }
  0x54   :  { %378 = vmatprep.subr.bf16.mxu1 %v497_v0 }
  0x57   :  { %380 = vmatpush3.bf16.msra.mxu1 %v379_v32 }
 0x114   :  { %v142_v34 = vpop.f32.mrb[0].mxu0 }
 0x115   :  { %v143_v35 = vadd.f32 %v280_v33, %v142_v34  ;;  %v315_v36 = vpop.f32.mrb[1].mxu0 }
 0x117   :  { %v146_v37 = vmul.f32 0.5, %v143_v35 }
 0x119   :  { %390 = vtanh.f32 %v146_v37 }
 0x123   :  { %v391_v38 = vpop.eup %390 }
 0x124   :  { %v151_v39 = vmul.f32 %v391_v38, %v391_v38  ;;  %v150_v41 = vadd.f32 %v391_v38, %v391_v38  ;;  %v148_v42 = vadd.f32 1.0, %v391_v38 }
 0x126   :  { %v152_v40 = vadd.f32 1.0, %v151_v39  ;;  %v149_v46 = vmul.f32 0.5, %v148_v42 }
 0x128   :  { %392 = vrcp.f32 %v152_v40 }
 0x132   :  { %v393_v43 = vpop.eup %392 }
 0x133   :  { %v154_v44 = vmul.f32 %v393_v43, %v150_v41 }
 0x135   :  { %v155_v45 = vsub.f32 %v154_v44, %v143_v35 }
 0x137   :  { %v156_v47 = vmul.f32 %v155_v45, %v149_v46 }
 0x139   :  { %v157_v48 = vadd.f32 %v156_v47, %v143_v35 }
 0x13b   :  { %349 = vmatmul.mubr.f32.vlgmr.msra.gmra.mrb[0].mxu1 %v157_v48 }
 0x20e   :  { %v247_v50 = vpop.f32.mrb[0].mxu1 }
 0x20f   :  { %v248_v51 = vadd.f32 %v282_v49, %v247_v50  ;;  %v350_v52 = vpop.f32.mrb[1].mxu1 }
 0x211   :  { %v251_v53 = vmul.f32 0.5, %v248_v51 }
 0x213   :  { %394 = vtanh.f32 %v251_v53 }
 0x21d   :  { %v395_v54 = vpop.eup %394 }
 0x21e   :  { %v256_v55 = vmul.f32 %v395_v54, %v395_v54  ;;  %v255_v57 = vadd.f32 %v395_v54, %v395_v54  ;;  %v253_v58 = vadd.f32 1.0, %v395_v54 }
 0x220   :  { %v257_v56 = vadd.f32 1.0, %v256_v55  ;;  %v254_v62 = vmul.f32 0.5, %v253_v58 }
 0x222   :  { %396 = vrcp.f32 %v257_v56 }
 0x22c   :  { %v397_v59 = vpop.eup %396 }
 0x22d   :  { %v259_v60 = vmul.f32 %v397_v59, %v255_v57 }
 0x22f   :  { %v260_v61 = vsub.f32 %v259_v60, %v248_v51 }
 0x231   :  { %v261_v63 = vmul.f32 %v260_v61, %v254_v62 }
 0x233   :  { %v262_v0 = vadd.f32 %v261_v63, %v248_v51 }
 0x235   :  { %263 = vst [vmem:[#allocation8] sm:$0xff] %v262_v0 }
 0x236   :  { %475 = shalt.err (!%p472_p0)
}
 0x237   :  { %s476_s10 = scalar_lea.hbm %s596_s5, 128 }
 0x238   :  { %p477_p1 = scmp.ne.s32.totalorder %s596_s5, %s476_s10  ;;  %p480_p2 = scmp.lt.u32.totalorder %s476_s10, %s596_s5 }
 0x23a   :  { %p482_p3 = pnand %p480_p2, %p477_p1 }
 0x23c   :  { %485 = shalt.err (!%p482_p3)
}
 0x23d   :  { %273 = dma.vmem_to_hbm [thread:$0]  %s271_s7, 128, %s596_s5, [#allocation4]  }
 0x23e   :  { %490 = dma.done.wait [#allocation4], 128  }
 0x23f   :  { %491 = vsyncadd [#allocation4], 4294967168 }
 0x240   :  { %277 = vsyncpa [#allocation3], 1 }
 0x241   :  { %278 = vsyncpa [#allocation6], 1 }
 0x242   :  { %279 = vsyncpa [#allocation4], 1 }

</bundles_post_ra>
